<compile_context>
chip_gen: v7x
topology: tpu7x:2x2x1
jax: 0.10.0
libtpu: 0.0.40
codegen_flags: <defaults>
</compile_context>

<pallas_src>
import functools

import jax
import jax.numpy as jnp
from jax.experimental import pallas as pl
from jax.experimental.pallas import tpu as pltpu


def _round_up(x, m):
    return ((x + m - 1) // m) * m


# ---------------------------------------------------------------------------
# Fused kernel: all GIN layers + global_add_pool + classifier head.
#   per layer l:  h = relu( relu((A_hat @ h) @ W1_l + b1_l) @ W2_l + b2_l )
#   pooled = P @ h
#   out    = relu(pooled @ HW1 + hb1) @ HW2 + hb2      (Dropout = identity)
# ---------------------------------------------------------------------------
def make_gin_fused_kernel(num_layers):
    def kernel(adj_ref, pool_ref, x_ref, *rest):
        n_w = 4 * num_layers + 4
        w_refs = rest[:n_w]
        o_ref = rest[n_w]

        adj = adj_ref[...]                      # (N_pad, N_pad) bf16, A + I, VMEM-resident
        h = x_ref[...]                          # (N_pad, C_pad) bf16

        for l in range(num_layers):             # unrolled; h stays in VMEM
            w1 = w_refs[4 * l + 0][...]         # bf16 (C_pad/H_pad, H_pad)
            b1 = w_refs[4 * l + 1][...]         # f32  (1, H_pad)
            w2 = w_refs[4 * l + 2][...]         # bf16 (H_pad, H_pad)
            b2 = w_refs[4 * l + 3][...]         # f32  (1, H_pad)

            # (1+eps)*x + sum_nbrs  ==  (A + I) @ h   (eps = 0, train_eps=False)
            z = jnp.dot(adj, h, preferred_element_type=jnp.float32)
            h1 = jnp.dot(z.astype(jnp.bfloat16), w1,
                         preferred_element_type=jnp.float32) + b1
            h1 = jnp.maximum(h1, 0.0)
            h2 = jnp.dot(h1.astype(jnp.bfloat16), w2,
                         preferred_element_type=jnp.float32) + b2
            h = jnp.maximum(h2, 0.0).astype(jnp.bfloat16)   # F.relu after each conv

        hw1, hb1, hw2, hb2 = (r[...] for r in w_refs[-4:])
        pooled = jnp.dot(pool_ref[...], h, preferred_element_type=jnp.float32)
        p1 = jnp.dot(pooled.astype(jnp.bfloat16), hw1,
                     preferred_element_type=jnp.float32) + hb1
        p1 = jnp.maximum(p1, 0.0)
        # Dropout(0.5) -> identity at inference.
        o_ref[...] = jnp.dot(p1.astype(jnp.bfloat16), hw2,
                             preferred_element_type=jnp.float32) + hb2

    return kernel


# ---------------------------------------------------------------------------
# Parameter construction (PyTorch-Linear-like uniform init) + lane padding.
# ---------------------------------------------------------------------------
def make_linear_params(key, fan_in, fan_out):
    kw, kb = jax.random.split(key)
    bound = 1.0 / jnp.sqrt(float(fan_in))
    # stored as (in, out): x @ W  ==  torch's  x @ W.T  with W (out, in)
    w = jax.random.uniform(kw, (fan_in, fan_out), jnp.float32, -bound, bound)
    b = jax.random.uniform(kb, (1, fan_out), jnp.float32, -bound, bound)
    return w, b


def init_gin_params(key, in_channels, hidden_channels, out_channels, num_layers):
    params = {"convs": [], "head": None}
    c_in = in_channels
    for _ in range(num_layers):
        key, k1, k2 = jax.random.split(key, 3)
        w1, b1 = make_linear_params(k1, c_in, hidden_channels)
        w2, b2 = make_linear_params(k2, hidden_channels, hidden_channels)
        params["convs"].append((w1, b1, w2, b2))
        c_in = hidden_channels
    key, k1, k2 = jax.random.split(key, 3)
    hw1, hb1 = make_linear_params(k1, hidden_channels, hidden_channels)
    hw2, hb2 = make_linear_params(k2, hidden_channels, out_channels)
    params["head"] = (hw1, hb1, hw2, hb2)
    return params


def _pad_w(w, rows, cols):
    return jnp.pad(w, ((0, rows - w.shape[0]), (0, cols - w.shape[1]))).astype(jnp.bfloat16)


def _pad_b(b, cols):
    return jnp.pad(b, ((0, 0), (0, cols - b.shape[1]))).astype(jnp.float32)


def pad_params(params, in_channels, hidden_channels, out_channels):
    c_pad = _round_up(in_channels, 128)
    h_pad = _round_up(hidden_channels, 128)
    o_pad = _round_up(out_channels, 128)
    padded = {"convs": [], "head": None}
    d_in = c_pad
    for (w1, b1, w2, b2) in params["convs"]:
        padded["convs"].append((_pad_w(w1, d_in, h_pad), _pad_b(b1, h_pad),
                                _pad_w(w2, h_pad, h_pad), _pad_b(b2, h_pad)))
        d_in = h_pad
    hw1, hb1, hw2, hb2 = params["head"]
    padded["head"] = (_pad_w(hw1, h_pad, h_pad), _pad_b(hb1, h_pad),
                      _pad_w(hw2, h_pad, o_pad), _pad_b(hb2, o_pad))
    return padded


# ---------------------------------------------------------------------------
# Full forward pass: glue (adjacency / pooling-matrix construction, padding)
# in plain JAX, the entire GNN forward in one Pallas kernel.
# ---------------------------------------------------------------------------
@functools.partial(jax.jit, static_argnames=("num_graphs", "out_channels"))
def gin_forward(padded_params, x, edge_index, batch, num_graphs, out_channels):
    n, c = x.shape
    convs = padded_params["convs"]
    head = padded_params["head"]
    num_layers = len(convs)
    c_pad = convs[0][0].shape[0]
    h_pad = convs[0][0].shape[1]
    o_pad = head[2].shape[1]
    n_pad = _round_up(max(n, 8), 128)          # lane-dense contraction dim for A_hat@h
    g_pad = _round_up(max(num_graphs, 8), 8)   # sublane-aligned pooled rows

    # Padded node features (bf16 MXU operand; zero rows/cols are inert).
    x_p = (jnp.zeros((n_pad, c_pad), jnp.float32).at[:n, :c].set(x)
           .astype(jnp.bfloat16))

    # Dense adjacency with self-loops folded in: A_hat[dst, src] += 1, A_hat[i,i] += 1.
    # Exact in bf16 (small integer counts). GIN sum-aggregation == A_hat @ x.
    src, dst = edge_index[0], edge_index[1]
    node_ids = jnp.arange(n, dtype=jnp.int32)
    adj = (jnp.zeros((n_pad, n_pad), jnp.float32)
           .at[dst, src].add(1.0)
           .at[node_ids, node_ids].add(1.0)).astype(jnp.bfloat16)

    # One-hot pooling matrix for global_add_pool (zeros on padded rows/cols).
    pool = (batch[None, :] == jnp.arange(num_graphs, dtype=batch.dtype)[:, None])
    pool_p = (jnp.zeros((g_pad, n_pad), jnp.bfloat16)
              .at[:num_graphs, :n].set(pool.astype(jnp.bfloat16)))

    flat_w = []
    for layer in convs:
        flat_w.extend(layer)
    flat_w.extend(head)

    # Advisory cost estimate (padded shapes).
    flops = 0
    d_in = c_pad
    for _ in range(num_layers):
        flops += 2 * n_pad * n_pad * d_in          # A_hat @ h
        flops += 2 * n_pad * d_in * h_pad          # (..)@ W1
        flops += 2 * n_pad * h_pad * h_pad         # (..)@ W2
        d_in = h_pad
    flops += 2 * g_pad * n_pad * h_pad             # P @ h
    flops += 2 * g_pad * h_pad * h_pad + 2 * g_pad * h_pad * o_pad
    inputs = [adj, pool_p, x_p] + flat_w
    in_bytes = sum(int(a.size) * a.dtype.itemsize for a in inputs)
    bytes_accessed = in_bytes + g_pad * o_pad * 4

    # Shape-derived scoped-VMEM budget (inputs + live activations), with headroom,
    # clamped so it stays sane on v7x (64 MiB physical VMEM).
    act_bytes = 6 * n_pad * max(c_pad, h_pad) * 4
    vmem_limit = int(min(max(2 * in_bytes + act_bytes, 32 * 1024 * 1024),
                         96 * 1024 * 1024))

    out_p = pl.pallas_call(
        make_gin_fused_kernel(num_layers),
        out_shape=jax.ShapeDtypeStruct((g_pad, o_pad), jnp.float32),
        in_specs=[pl.BlockSpec(memory_space=pltpu.MemorySpace.VMEM)] * len(inputs),
        out_specs=pl.BlockSpec(memory_space=pltpu.MemorySpace.VMEM),
        compiler_params=pltpu.CompilerParams(vmem_limit_bytes=vmem_limit),
        cost_estimate=pl.CostEstimate(flops=flops, transcendentals=0,
                                      bytes_accessed=bytes_accessed),
    )(adj, pool_p, x_p, *flat_w)

    return out_p[:num_graphs, :out_channels]


# ---------------------------------------------------------------------------
# Pure-JAX reference (f32, unpadded) for a numerical sanity check.
# ---------------------------------------------------------------------------
def gin_reference(params, x, edge_index, batch, num_graphs):
    n = x.shape[0]
    src, dst = edge_index[0], edge_index[1]
    adj = jnp.zeros((n, n), jnp.float32).at[dst, src].add(1.0)
    pool = (batch[None, :] == jnp.arange(num_graphs)[:, None]).astype(jnp.float32)
    h = x
    for (w1, b1, w2, b2) in params["convs"]:
        z = h + adj @ h
        h = jnp.maximum(jnp.maximum(z @ w1 + b1, 0.0) @ w2 + b2, 0.0)
    pooled = pool @ h
    hw1, hb1, hw2, hb2 = params["head"]
    return jnp.maximum(pooled @ hw1 + hb1, 0.0) @ hw2 + hb2


if __name__ == "__main__":
    # Small synthetic problem: 2 graphs of 8 nodes each (16 nodes total),
    # in_channels=8, hidden=32, out=4, 2 GIN layers.
    in_channels, hidden_channels, out_channels, num_layers = 8, 32, 4, 2
    nodes_per_graph, num_graphs = 8, 2
    n = nodes_per_graph * num_graphs

    key = jax.random.PRNGKey(0)
    key, kx, kp = jax.random.split(key, 3)

    x = jax.random.normal(kx, (n, in_channels), jnp.float32)

    # Ring edges within each graph (directed both ways), no cross-graph edges.
    srcs, dsts = [], []
    for g in range(num_graphs):
        base = g * nodes_per_graph
        for i in range(nodes_per_graph):
            a = base + i
            b = base + (i + 1) % nodes_per_graph
            srcs += [a, b]
            dsts += [b, a]
    edge_index = jnp.array([srcs, dsts], dtype=jnp.int32)
    batch = jnp.repeat(jnp.arange(num_graphs, dtype=jnp.int32), nodes_per_graph)

    params = init_gin_params(kp, in_channels, hidden_channels, out_channels, num_layers)
    padded = pad_params(params, in_channels, hidden_channels, out_channels)

    out = gin_forward(padded, x, edge_index, batch, num_graphs, out_channels)
    jax.block_until_ready(out)
    assert out.shape == (num_graphs, out_channels)

    # bf16-MXU / f32-accumulate vs pure-f32 reference: loose tolerance.
    ref = gin_reference(params, x, edge_index, batch, num_graphs)
    max_err = float(jnp.max(jnp.abs(out - ref)))
    tol = 5e-2 + 5e-2 * float(jnp.max(jnp.abs(ref)))
    assert max_err <= tol, f"mismatch: max_err={max_err}, tol={tol}"

    print("KERNEL_OK")
</pallas_src>

<mosaic_0001>
module attributes {stable_mosaic.version = 11 : i64} {
  func.func private @main(%arg0: i32) attributes {dimension_semantics = [#tpu.dimension_semantics<core_parallel>], iteration_bounds = array<i64: 2>, tpu.core_type = #tpu.core_type<sc_scalar_subcore>, window_params = []} {
    return
  }
}

module attributes {stable_mosaic.version = 11 : i64} {
  func.func private @main(%arg0: i32) attributes {dimension_semantics = [#tpu.dimension_semantics<core_parallel>], iteration_bounds = array<i64: 2>, tpu.core_type = #tpu.core_type<sc_scalar_subcore>, window_params = []} {
    return
  }
}

module attributes {stable_mosaic.version = 11 : i64} {
  func.func @kernel(%arg0: memref<128x128xbf16, #tpu.memory_space<vmem>>, %arg1: memref<8x128xbf16, #tpu.memory_space<vmem>>, %arg2: memref<128x128xbf16, #tpu.memory_space<vmem>>, %arg3: memref<128x128xbf16, #tpu.memory_space<vmem>>, %arg4: memref<1x128xf32, #tpu.memory_space<vmem>>, %arg5: memref<128x128xbf16, #tpu.memory_space<vmem>>, %arg6: memref<1x128xf32, #tpu.memory_space<vmem>>, %arg7: memref<128x128xbf16, #tpu.memory_space<vmem>>, %arg8: memref<1x128xf32, #tpu.memory_space<vmem>>, %arg9: memref<128x128xbf16, #tpu.memory_space<vmem>>, %arg10: memref<1x128xf32, #tpu.memory_space<vmem>>, %arg11: memref<128x128xbf16, #tpu.memory_space<vmem>>, %arg12: memref<1x128xf32, #tpu.memory_space<vmem>>, %arg13: memref<128x128xbf16, #tpu.memory_space<vmem>>, %arg14: memref<1x128xf32, #tpu.memory_space<vmem>>, %arg15: memref<8x128xf32, #tpu.memory_space<vmem>>) attributes {dimension_semantics = [], scalar_prefetch = 0 : i64, scratch_operands = 0 : i64, tpu.core_type = #tpu.core_type<tc>} {
    %c0 = arith.constant 0 : index
    %c0_0 = arith.constant 0 : index
    %0 = vector.load %arg0[%c0, %c0_0] : memref<128x128xbf16, #tpu.memory_space<vmem>>, vector<128x128xbf16>
    %c0_1 = arith.constant 0 : index
    %c0_2 = arith.constant 0 : index
    %1 = vector.load %arg2[%c0_1, %c0_2] : memref<128x128xbf16, #tpu.memory_space<vmem>>, vector<128x128xbf16>
    %c0_3 = arith.constant 0 : index
    %c0_4 = arith.constant 0 : index
    %2 = vector.load %arg3[%c0_3, %c0_4] : memref<128x128xbf16, #tpu.memory_space<vmem>>, vector<128x128xbf16>
    %c0_5 = arith.constant 0 : index
    %c0_6 = arith.constant 0 : index
    %3 = vector.load %arg4[%c0_5, %c0_6] : memref<1x128xf32, #tpu.memory_space<vmem>>, vector<1x128xf32>
    %c0_7 = arith.constant 0 : index
    %c0_8 = arith.constant 0 : index
    %4 = vector.load %arg5[%c0_7, %c0_8] : memref<128x128xbf16, #tpu.memory_space<vmem>>, vector<128x128xbf16>
    %c0_9 = arith.constant 0 : index
    %c0_10 = arith.constant 0 : index
    %5 = vector.load %arg6[%c0_9, %c0_10] : memref<1x128xf32, #tpu.memory_space<vmem>>, vector<1x128xf32>
    %cst = arith.constant dense<0.000000e+00> : vector<128x128xf32>
    %6 = tpu.matmul %0, %1, %cst {dimension_numbers = #tpu.dot_dimension_numbers<[1], [0], [0], [1], [0, 0, 1, 1], [], []>} : vector<128x128xbf16>, vector<128x128xbf16>, vector<128x128xf32> -> vector<128x128xf32>
    %7 = arith.truncf %6 : vector<128x128xf32> to vector<128x128xbf16>
    %cst_11 = arith.constant dense<0.000000e+00> : vector<128x128xf32>
    %8 = tpu.matmul %7, %2, %cst_11 {dimension_numbers = #tpu.dot_dimension_numbers<[1], [0], [0], [1], [0, 0, 1, 1], [], []>} : vector<128x128xbf16>, vector<128x128xbf16>, vector<128x128xf32> -> vector<128x128xf32>
    %9 = vector.broadcast %3 : vector<1x128xf32> to vector<128x128xf32>
    %10 = arith.addf %8, %9 : vector<128x128xf32>
    %cst_12 = arith.constant 0.000000e+00 : f32
    %11 = vector.broadcast %cst_12 : f32 to vector<128x128xf32>
    %12 = arith.maximumf %10, %11 : vector<128x128xf32>
    %13 = arith.truncf %12 : vector<128x128xf32> to vector<128x128xbf16>
    %cst_13 = arith.constant dense<0.000000e+00> : vector<128x128xf32>
    %14 = tpu.matmul %13, %4, %cst_13 {dimension_numbers = #tpu.dot_dimension_numbers<[1], [0], [0], [1], [0, 0, 1, 1], [], []>} : vector<128x128xbf16>, vector<128x128xbf16>, vector<128x128xf32> -> vector<128x128xf32>
    %15 = vector.broadcast %5 : vector<1x128xf32> to vector<128x128xf32>
    %16 = arith.addf %14, %15 : vector<128x128xf32>
    %cst_14 = arith.constant 0.000000e+00 : f32
    %17 = vector.broadcast %cst_14 : f32 to vector<128x128xf32>
    %18 = arith.maximumf %16, %17 : vector<128x128xf32>
    %19 = arith.truncf %18 : vector<128x128xf32> to vector<128x128xbf16>
    %c0_15 = arith.constant 0 : index
    %c0_16 = arith.constant 0 : index
    %20 = vector.load %arg7[%c0_15, %c0_16] : memref<128x128xbf16, #tpu.memory_space<vmem>>, vector<128x128xbf16>
    %c0_17 = arith.constant 0 : index
    %c0_18 = arith.constant 0 : index
    %21 = vector.load %arg8[%c0_17, %c0_18] : memref<1x128xf32, #tpu.memory_space<vmem>>, vector<1x128xf32>
    %c0_19 = arith.constant 0 : index
    %c0_20 = arith.constant 0 : index
    %22 = vector.load %arg9[%c0_19, %c0_20] : memref<128x128xbf16, #tpu.memory_space<vmem>>, vector<128x128xbf16>
    %c0_21 = arith.constant 0 : index
    %c0_22 = arith.constant 0 : index
    %23 = vector.load %arg10[%c0_21, %c0_22] : memref<1x128xf32, #tpu.memory_space<vmem>>, vector<1x128xf32>
    %cst_23 = arith.constant dense<0.000000e+00> : vector<128x128xf32>
    %24 = tpu.matmul %0, %19, %cst_23 {dimension_numbers = #tpu.dot_dimension_numbers<[1], [0], [0], [1], [0, 0, 1, 1], [], []>} : vector<128x128xbf16>, vector<128x128xbf16>, vector<128x128xf32> -> vector<128x128xf32>
    %25 = arith.truncf %24 : vector<128x128xf32> to vector<128x128xbf16>
    %cst_24 = arith.constant dense<0.000000e+00> : vector<128x128xf32>
    %26 = tpu.matmul %25, %20, %cst_24 {dimension_numbers = #tpu.dot_dimension_numbers<[1], [0], [0], [1], [0, 0, 1, 1], [], []>} : vector<128x128xbf16>, vector<128x128xbf16>, vector<128x128xf32> -> vector<128x128xf32>
    %27 = vector.broadcast %21 : vector<1x128xf32> to vector<128x128xf32>
    %28 = arith.addf %26, %27 : vector<128x128xf32>
    %cst_25 = arith.constant 0.000000e+00 : f32
    %29 = vector.broadcast %cst_25 : f32 to vector<128x128xf32>
    %30 = arith.maximumf %28, %29 : vector<128x128xf32>
    %31 = arith.truncf %30 : vector<128x128xf32> to vector<128x128xbf16>
    %cst_26 = arith.constant dense<0.000000e+00> : vector<128x128xf32>
    %32 = tpu.matmul %31, %22, %cst_26 {dimension_numbers = #tpu.dot_dimension_numbers<[1], [0], [0], [1], [0, 0, 1, 1], [], []>} : vector<128x128xbf16>, vector<128x128xbf16>, vector<128x128xf32> -> vector<128x128xf32>
    %33 = vector.broadcast %23 : vector<1x128xf32> to vector<128x128xf32>
    %34 = arith.addf %32, %33 : vector<128x128xf32>
    %cst_27 = arith.constant 0.000000e+00 : f32
    %35 = vector.broadcast %cst_27 : f32 to vector<128x128xf32>
    %36 = arith.maximumf %34, %35 : vector<128x128xf32>
    %37 = arith.truncf %36 : vector<128x128xf32> to vector<128x128xbf16>
    %c0_28 = arith.constant 0 : index
    %c0_29 = arith.constant 0 : index
    %38 = vector.load %arg11[%c0_28, %c0_29] : memref<128x128xbf16, #tpu.memory_space<vmem>>, vector<128x128xbf16>
    %c0_30 = arith.constant 0 : index
    %c0_31 = arith.constant 0 : index
    %39 = vector.load %arg12[%c0_30, %c0_31] : memref<1x128xf32, #tpu.memory_space<vmem>>, vector<1x128xf32>
    %c0_32 = arith.constant 0 : index
    %c0_33 = arith.constant 0 : index
    %40 = vector.load %arg13[%c0_32, %c0_33] : memref<128x128xbf16, #tpu.memory_space<vmem>>, vector<128x128xbf16>
    %c0_34 = arith.constant 0 : index
    %c0_35 = arith.constant 0 : index
    %41 = vector.load %arg14[%c0_34, %c0_35] : memref<1x128xf32, #tpu.memory_space<vmem>>, vector<1x128xf32>
    %c0_36 = arith.constant 0 : index
    %c0_37 = arith.constant 0 : index
    %42 = vector.load %arg1[%c0_36, %c0_37] : memref<8x128xbf16, #tpu.memory_space<vmem>>, vector<8x128xbf16>
    %cst_38 = arith.constant dense<0.000000e+00> : vector<8x128xf32>
    %43 = tpu.matmul %42, %37, %cst_38 {dimension_numbers = #tpu.dot_dimension_numbers<[1], [0], [0], [1], [0, 0, 1, 1], [], []>} : vector<8x128xbf16>, vector<128x128xbf16>, vector<8x128xf32> -> vector<8x128xf32>
    %44 = arith.truncf %43 : vector<8x128xf32> to vector<8x128xbf16>
    %cst_39 = arith.constant dense<0.000000e+00> : vector<8x128xf32>
    %45 = tpu.matmul %44, %38, %cst_39 {dimension_numbers = #tpu.dot_dimension_numbers<[1], [0], [0], [1], [0, 0, 1, 1], [], []>} : vector<8x128xbf16>, vector<128x128xbf16>, vector<8x128xf32> -> vector<8x128xf32>
    %46 = vector.broadcast %39 : vector<1x128xf32> to vector<8x128xf32>
    %47 = arith.addf %45, %46 : vector<8x128xf32>
    %cst_40 = arith.constant 0.000000e+00 : f32
    %48 = vector.broadcast %cst_40 : f32 to vector<8x128xf32>
    %49 = arith.maximumf %47, %48 : vector<8x128xf32>
    %50 = arith.truncf %49 : vector<8x128xf32> to vector<8x128xbf16>
    %cst_41 = arith.constant dense<0.000000e+00> : vector<8x128xf32>
    %51 = tpu.matmul %50, %40, %cst_41 {dimension_numbers = #tpu.dot_dimension_numbers<[1], [0], [0], [1], [0, 0, 1, 1], [], []>} : vector<8x128xbf16>, vector<128x128xbf16>, vector<8x128xf32> -> vector<8x128xf32>
    %52 = vector.broadcast %41 : vector<1x128xf32> to vector<8x128xf32>
    %53 = arith.addf %51, %52 : vector<8x128xf32>
    %c0_42 = arith.constant 0 : index
    %c0_43 = arith.constant 0 : index
    %54 = vector.load %arg15[%c0_42, %c0_43] : memref<8x128xf32, #tpu.memory_space<vmem>>, vector<8x128xf32>
    tpu.vector_store %arg15[%c0_42, %c0_43], %53 {strides = array<i32>} : memref<8x128xf32, #tpu.memory_space<vmem>>, vector<8x128xf32>,
    return
  }
}

</mosaic_0001>

<bundles_post_ra>
// kernel: gin_forward.1
= control target key start
LH: loop header
LB: loop body
LE: loop exit
PB: predicated region body
PF: predicated region fallthrough
CT: control target
= control target key end

     0   :  { %vm1940_vm0 = vmmov 0   ;;  %s2299_s2 = inlined_call_operand.vmem [shape: bf16[128,128], index: 2, kind: input, shape index: {}]   ;;  %s2300_s0 = inlined_call_operand.vmem [shape: bf16[128,128], index: 0, kind: input, shape index: {}]   ;;  %s2301_s3 = inlined_call_operand.vmem [shape: bf16[128,128], index: 3, kind: input, shape index: {}]   ;;  %s2302_s5 = inlined_call_operand.vmem [shape: bf16[128,128], index: 5, kind: input, shape index: {}]   ;;  %s2303_s4 = inlined_call_operand.vmem [shape: f32[1,128], index: 4, kind: input, shape index: {}]   ;;  %s2304_s7 = inlined_call_operand.vmem [shape: bf16[128,128], index: 7, kind: input, shape index: {}]   ;;  %s2305_s6 = inlined_call_operand.vmem [shape: f32[1,128], index: 6, kind: input, shape index: {}]   ;;  %s2306_s9 = inlined_call_operand.vmem [shape: bf16[128,128], index: 9, kind: input, shape index: {}]   ;;  %s2307_s8 = inlined_call_operand.vmem [shape: f32[1,128], index: 8, kind: input, shape index: {}]   ;;  %s2308_s11 = inlined_call_operand.vmem [shape: bf16[128,128], index: 11, kind: input, shape index: {}]   ;;  %s2309_s10 = inlined_call_operand.vmem [shape: f32[1,128], index: 10, kind: input, shape index: {}]   ;;  %s2310_s1 = inlined_call_operand.vmem [shape: bf16[8,128], index: 1, kind: input, shape index: {}]   ;;  %s2311_s13 = inlined_call_operand.vmem [shape: bf16[128,128], index: 13, kind: input, shape index: {}]   ;;  %s2312_s12 = inlined_call_operand.vmem [shape: f32[1,128], index: 12, kind: input, shape index: {}]   ;;  %s2313_s14 = inlined_call_operand.vmem [shape: f32[1,128], index: 14, kind: input, shape index: {}]   ;;  %s2314_s15 = inlined_call_operand.vmem [shape: f32[8,128], index: 15, kind: output, shape index: {}]  }
   0x1   :  { %v1875_v0 = vld [vmem:[%s2299_s2] sm:$0xff]   ;;  %v1876_v1 = vld [vmem:[%s2299_s2 + $0x8] sm:$0xff]   ;;  %v1877_v2 = vld [vmem:[%s2299_s2 + $0x10] sm:$0xff]  }
   0x2   :  { %1621 = vmatprep.subr.bf16.mxu0 %v1875_v0  ;;  %v1878_v3 = vld [vmem:[%s2299_s2 + $0x18] sm:$0xff]   ;;  %v2036_v4 = vld [vmem:[%s2300_s0] sm:$0xff]   ;;  %v1880_v6 = vld [vmem:[%s2299_s2 + $0x28] sm:$0xff]  }
   0x3   :  { %1622 = vmatpush3.bf16.msra.mxu0 %v1875_v0  ;;  %1637 = vmatprep.mubr.bf16.mxu0 %v2036_v4  ;;  %v1879_v5 = vld [vmem:[%s2299_s2 + $0x20] sm:$0xff]   ;;  %v1892_v8 = vld [vmem:[%s2301_s3 + $0x8] sm:$0xff]   ;;  %v1881_v9 = vld [vmem:[%s2299_s2 + $0x30] sm:$0xff]  }
   0x4   :  { %1623 = vmatprep.subr.bf16.mxu0 %v1876_v1  ;;  %v1891_v7 = vld [vmem:[%s2301_s3] sm:$0xff]   ;;  %v1893_v10 = vld [vmem:[%s2301_s3 + $0x10] sm:$0xff]   ;;  %v1882_v11 = vld [vmem:[%s2299_s2 + $0x38] sm:$0xff]  }
   0x5   :  { %1653 = vmatprep.subr.bf16.mxu1 %v1891_v7  ;;  %v1894_v12 = vld [vmem:[%s2301_s3 + $0x18] sm:$0xff]   ;;  %v1895_v13 = vld [vmem:[%s2301_s3 + $0x20] sm:$0xff]   ;;  %v2069_v14 = vld [vmem:[%s2300_s0 + $0x8] sm:$0xff]  }
   0x6   :  { %1654 = vmatpush3.bf16.msra.mxu1 %v1891_v7  ;;  %v2074_v15 = vld [vmem:[%s2300_s0 + $0x10] sm:$0xff]   ;;  %v1896_v16 = vld [vmem:[%s2301_s3 + $0x28] sm:$0xff]   ;;  %v2087_v18 = vld [vmem:[%s2300_s0 + $0x18] sm:$0xff]  }
   0x7   :  { %1624 = vmatpush3.bf16.msra.mxu0 %v1876_v1  ;;  %1655 = vmatprep.subr.bf16.mxu1 %v1892_v8  ;;  %v1897_v17 = vld [vmem:[%s2301_s3 + $0x30] sm:$0xff]   ;;  %v2092_v19 = vld [vmem:[%s2300_s0 + $0x20] sm:$0xff]   ;;  %v2099_v20 = vld [vmem:[%s2300_s0 + $0x28] sm:$0xff]  }
   0x8   :  { %1625 = vmatprep.subr.bf16.mxu0 %v1877_v2  ;;  %v2104_v21 = vld [vmem:[%s2300_s0 + $0x30] sm:$0xff]   ;;  %v2111_v22 = vld [vmem:[%s2300_s0 + $0x38] sm:$0xff]   ;;  %v1899_v24 = vld [vmem:[%s2302_s5] sm:$0xff]  }
   0x9   :  { %v1898_v23 = vld [vmem:[%s2301_s3 + $0x38] sm:$0xff]   ;;  %v1900_v25 = vld [vmem:[%s2302_s5 + $0x8] sm:$0xff]   ;;  %v1901_v26 = vld [vmem:[%s2302_s5 + $0x10] sm:$0xff]  }
   0xa   :  { %1656 = vmatpush3.bf16.msra.mxu1 %v1892_v8  ;;  %v1902_v27 = vld [vmem:[%s2302_s5 + $0x18] sm:$0xff]   ;;  %v1903_v28 = vld [vmem:[%s2302_s5 + $0x20] sm:$0xff]   ;;  %v1904_v29 = vld [vmem:[%s2302_s5 + $0x28] sm:$0xff]  }
   0xb   :  { %1626 = vmatpush3.bf16.msra.mxu0 %v1877_v2  ;;  %1657 = vmatprep.subr.bf16.mxu1 %v1893_v10  ;;  %v1905_v54 = vld [vmem:[%s2302_s5 + $0x30] sm:$0xff]   ;;  %v1906_v55 = vld [vmem:[%s2302_s5 + $0x38] sm:$0xff]   ;;  %v1444_v56 = vld [vmem:[%s2303_s4] ss:$0 sm:$0xff] }
   0xc   :  { %1627 = vmatprep.subr.bf16.mxu0 %v1878_v3 }
   0xe   :  { %1658 = vmatpush3.bf16.msra.mxu1 %v1893_v10 }
   0xf   :  { %1628 = vmatpush3.bf16.msra.mxu0 %v1878_v3  ;;  %1659 = vmatprep.subr.bf16.mxu1 %v1894_v12 }
  0x10   :  { %1629 = vmatprep.subr.bf16.mxu0 %v1879_v5 }
  0x12   :  { %1660 = vmatpush3.bf16.msra.mxu1 %v1894_v12 }
  0x13   :  { %1630 = vmatpush3.bf16.msra.mxu0 %v1879_v5  ;;  %1661 = vmatprep.subr.bf16.mxu1 %v1895_v13 }
  0x14   :  { %1631 = vmatprep.subr.bf16.mxu0 %v1880_v6 }
  0x16   :  { %1662 = vmatpush3.bf16.msra.mxu1 %v1895_v13 }
  0x17   :  { %1632 = vmatpush3.bf16.msra.mxu0 %v1880_v6  ;;  %1663 = vmatprep.subr.bf16.mxu1 %v1896_v16 }
  0x18   :  { %1633 = vmatprep.subr.bf16.mxu0 %v1881_v9 }
  0x1a   :  { %1664 = vmatpush3.bf16.msra.mxu1 %v1896_v16 }
  0x1b   :  { %1634 = vmatpush3.bf16.msra.mxu0 %v1881_v9  ;;  %1665 = vmatprep.subr.bf16.mxu1 %v1897_v17 }
  0x1c   :  { %1635 = vmatprep.subr.bf16.mxu0 %v1882_v11 }
  0x1e   :  { %1666 = vmatpush3.bf16.msra.mxu1 %v1897_v17 }
  0x1f   :  { %1636 = vmatpush3.bf16.msra.mxu0 %v1882_v11  ;;  %1667 = vmatprep.subr.bf16.mxu1 %v1898_v23 }
  0x20   :  { %1685 = vmatprep.subr.bf16.mxu0 %v1899_v24 }
  0x22   :  { %1638 = vmatmul.mubr.bf16.vlgmr.msra.gmra.mrb[0].mxu0 %v2069_v14  ;;  %1668 = vmatpush3.bf16.msra.mxu1 %v1898_v23 }
  0x23   :  { %1641 = vmatprep.mubr.bf16.mxu0 %v2074_v15  ;;  %1686 = vmatpush3.bf16.msra.mxu0 %v1899_v24 }
  0x24   :  { %1687 = vmatprep.subr.bf16.mxu0 %v1900_v25 }
  0x27   :  { %1688 = vmatpush3.bf16.msra.mxu0 %v1900_v25 }
  0x28   :  { %1689 = vmatprep.subr.bf16.mxu0 %v1901_v26 }
  0x2a   :  { %1642 = vmatmul.mubr.bf16.gmra.mrb[4].mxu0 %v2087_v18 }
  0x2b   :  { %1645 = vmatprep.mubr.bf16.mxu0 %v2092_v19  ;;  %1690 = vmatpush3.bf16.msra.mxu0 %v1901_v26 }
  0x2c   :  { %1691 = vmatprep.subr.bf16.mxu0 %v1902_v27 }
  0x2f   :  { %1692 = vmatpush3.bf16.msra.mxu0 %v1902_v27 }
  0x30   :  { %1693 = vmatprep.subr.bf16.mxu0 %v1903_v28 }
  0x32   :  { %1646 = vmatmul.mubr.bf16.gmra.mrb[8].mxu0 %v2099_v20 }
  0x33   :  { %1649 = vmatprep.mubr.bf16.mxu0 %v2104_v21  ;;  %1694 = vmatpush3.bf16.msra.mxu0 %v1903_v28 }
  0x34   :  { %1695 = vmatprep.subr.bf16.mxu0 %v1904_v29 }
  0x37   :  { %1696 = vmatpush3.bf16.msra.mxu0 %v1904_v29 }
  0x38   :  { %1697 = vmatprep.subr.bf16.mxu0 %v1905_v54 }
  0x3a   :  { %1650 = vmatmul.mubr.bf16.gmra.mrb[12].mxu0 %v2111_v22 }
  0x3b   :  { %1698 = vmatpush3.bf16.msra.mxu0 %v1905_v54 }
  0x3c   :  { %1699 = vmatprep.subr.bf16.mxu0 %v1906_v55 }
  0x3f   :  { %1700 = vmatpush3.bf16.msra.mxu0 %v1906_v55 }
  0xf5   :  { %v1639_v30 = vpop.f32.mrb[0].mxu0 }
  0xf6   :  { %v247_v31 = vpop.f32.mrb[1].mxu0 }
  0xf7   :  { %v1640_v32 = vpop.f32.mrb[2].mxu0 }
  0xf8   :  { %v311_v33 = vpack.c.bf16 %v1640_v32, %v1639_v30  ;;  %v250_v34 = vpop.f32.mrb[3].mxu0 }
  0xf9   :  { %v310_v35 = vpack.c.bf16 %v250_v34, %v247_v31 }
  0xfb   :  { %1669 = vmatprep.mubr.bf16.mxu1 %v310_v35 }
  0xfc   :  { %1670 = vmatmul.mubr.bf16.vlgmr.msra.gmra.mrb[0].mxu1 %v311_v33 }
  0xfd   :  { %v1643_v36 = vpop.f32.mrb[4].mxu0 }
  0xfe   :  { %v263_v37 = vpop.f32.mrb[5].mxu0 }
  0xff   :  { %v1644_v38 = vpop.f32.mrb[6].mxu0 }
 0x100   :  { %v313_v39 = vpack.c.bf16 %v1644_v38, %v1643_v36  ;;  %v266_v40 = vpop.f32.mrb[7].mxu0 }
 0x101   :  { %v312_v41 = vpack.c.bf16 %v266_v40, %v263_v37 }
 0x103   :  { %1673 = vmatprep.mubr.bf16.mxu1 %v312_v41 }
 0x104   :  { %1674 = vmatmul.mubr.bf16.gmra.mrb[4].mxu1 %v313_v39 }
 0x105   :  { %v1647_v42 = vpop.f32.mrb[8].mxu0 }
 0x106   :  { %v279_v43 = vpop.f32.mrb[9].mxu0 }
 0x107   :  { %v1648_v44 = vpop.f32.mrb[10].mxu0 }
 0x108   :  { %v315_v45 = vpack.c.bf16 %v1648_v44, %v1647_v42  ;;  %v282_v46 = vpop.f32.mrb[11].mxu0 }
 0x109   :  { %v314_v47 = vpack.c.bf16 %v282_v46, %v279_v43 }
 0x10b   :  { %1677 = vmatprep.mubr.bf16.mxu1 %v314_v47 }
 0x10c   :  { %1678 = vmatmul.mubr.bf16.gmra.mrb[8].mxu1 %v315_v45 }
 0x10d   :  { %v1651_v48 = vpop.f32.mrb[12].mxu0 }
 0x10e   :  { %v295_v49 = vpop.f32.mrb[13].mxu0 }
 0x10f   :  { %v1652_v50 = vpop.f32.mrb[14].mxu0 }
 0x110   :  { %v317_v51 = vpack.c.bf16 %v1652_v50, %v1651_v48  ;;  %v298_v52 = vpop.f32.mrb[15].mxu0 }
 0x111   :  { %v316_v53 = vpack.c.bf16 %v298_v52, %v295_v49 }
 0x113   :  { %1681 = vmatprep.mubr.bf16.mxu1 %v316_v53 }
 0x114   :  { %1682 = vmatmul.mubr.bf16.gmra.mrb[12].mxu1 %v317_v51 }
 0x115   :  { %1733 = vmatprep.mubr.bf16.mxu1 %v2036_v4 }
 0x1cf   :  { %v1671_v57 = vpop.f32.mrb[0].mxu1 }
 0x1d0   :  { %v415_v58 = vadd.f32 %v1671_v57, %v1444_v56  ;;  %v406_v59 = vpop.f32.mrb[1].mxu1  ;;  %v1907_v57 = vld [vmem:[%s2304_s7] sm:$0xff]  }
 0x1d1   :  { %v407_v60 = vadd.f32 %v1444_v56, %v406_v59  ;;  %v1672_v61 = vpop.f32.mrb[2].mxu1  ;;  %1749 = vmatprep.subr.bf16.mxu0 %v1907_v57  ;;  %v1910_v59 = vld [vmem:[%s2304_s7 + $0x18] sm:$0xff]  }
 0x1d2   :  { %v418_v62 = vadd.f32 %v1672_v61, %v1444_v56  ;;  %v409_v63 = vpop.f32.mrb[3].mxu1  ;;  %v471_v1 = vmax.f32 %v415_v58, 0.0  ;;  %v1908_v58 = vld [vmem:[%s2304_s7 + $0x8] sm:$0xff]  }
 0x1d3   :  { %v410_v0 = vadd.f32 %v1444_v56, %v409_v63  ;;  %v469_v3 = vmax.f32 %v407_v60, 0.0  ;;  %v1911_v60 = vld [vmem:[%s2304_s7 + $0x20] sm:$0xff]   ;;  %v1912_v61 = vld [vmem:[%s2304_s7 + $0x28] sm:$0xff]  }
 0x1d4   :  { %v472_v2 = vmax.f32 %v418_v62, 0.0  ;;  %v1913_v62 = vld [vmem:[%s2304_s7 + $0x30] sm:$0xff]   ;;  %v1453_v63 = vld [vmem:[%s2305_s6] ss:$0 sm:$0xff] }
 0x1d5   :  { %v470_v4 = vmax.f32 %v410_v0, 0.0 }
 0x1d6   :  { %v486_v5 = vpack.c.bf16 %v472_v2, %v471_v1 }
 0x1d7   :  { %v485_v6 = vpack.c.bf16 %v470_v4, %v469_v3  ;;  %v1675_v7 = vpop.f32.mrb[4].mxu1 }
 0x1d8   :  { %v431_v8 = vadd.f32 %v1675_v7, %v1444_v56  ;;  %v422_v9 = vpop.f32.mrb[5].mxu1 }
 0x1d9   :  { %v423_v10 = vadd.f32 %v1444_v56, %v422_v9  ;;  %v1676_v11 = vpop.f32.mrb[6].mxu1  ;;  %1701 = vmatprep.mubr.bf16.mxu0 %v485_v6 }
 0x1da   :  { %v434_v12 = vadd.f32 %v1676_v11, %v1444_v56  ;;  %v425_v13 = vpop.f32.mrb[7].mxu1  ;;  %1702 = vmatmul.mubr.bf16.vlgmr.msra.gmra.mrb[16].mxu0 %v486_v5  ;;  %v475_v17 = vmax.f32 %v431_v8, 0.0 }
 0x1db   :  { %v426_v16 = vadd.f32 %v1444_v56, %v425_v13  ;;  %v473_v24 = vmax.f32 %v423_v10, 0.0  ;;  %1750 = vmatpush3.bf16.msra.mxu0 %v1907_v57 }
 0x1dc   :  { %v476_v23 = vmax.f32 %v434_v12, 0.0  ;;  %1751 = vmatprep.subr.bf16.mxu0 %v1908_v58 }
 0x1dd   :  { %v474_v25 = vmax.f32 %v426_v16, 0.0 }
 0x1de   :  { %v488_v26 = vpack.c.bf16 %v476_v23, %v475_v17 }
 0x1df   :  { %v487_v27 = vpack.c.bf16 %v474_v25, %v473_v24  ;;  %v1679_v28 = vpop.f32.mrb[8].mxu1  ;;  %1752 = vmatpush3.bf16.msra.mxu0 %v1908_v58 }
 0x1e0   :  { %v447_v29 = vadd.f32 %v1679_v28, %v1444_v56  ;;  %v438_v30 = vpop.f32.mrb[9].mxu1 }
 0x1e1   :  { %v439_v31 = vadd.f32 %v1444_v56, %v438_v30  ;;  %v1680_v32 = vpop.f32.mrb[10].mxu1  ;;  %1705 = vmatprep.mubr.bf16.mxu0 %v487_v27 }
 0x1e2   :  { %v450_v33 = vadd.f32 %v1680_v32, %v1444_v56  ;;  %v441_v34 = vpop.f32.mrb[11].mxu1  ;;  %1706 = vmatmul.mubr.bf16.gmra.mrb[20].mxu0 %v488_v26  ;;  %v479_v36 = vmax.f32 %v447_v29, 0.0 }
 0x1e3   :  { %v442_v35 = vadd.f32 %v1444_v56, %v441_v34  ;;  %v477_v38 = vmax.f32 %v439_v31, 0.0 }
 0x1e4   :  { %v480_v37 = vmax.f32 %v450_v33, 0.0 }
 0x1e5   :  { %v478_v39 = vmax.f32 %v442_v35, 0.0 }
 0x1e6   :  { %v490_v40 = vpack.c.bf16 %v480_v37, %v479_v36 }
 0x1e7   :  { %v489_v41 = vpack.c.bf16 %v478_v39, %v477_v38  ;;  %v1683_v42 = vpop.f32.mrb[12].mxu1 }
 0x1e8   :  { %v463_v43 = vadd.f32 %v1683_v42, %v1444_v56  ;;  %v454_v44 = vpop.f32.mrb[13].mxu1 }
 0x1e9   :  { %v455_v45 = vadd.f32 %v1444_v56, %v454_v44  ;;  %v1684_v46 = vpop.f32.mrb[14].mxu1  ;;  %1709 = vmatprep.mubr.bf16.mxu0 %v489_v41 }
 0x1ea   :  { %v466_v47 = vadd.f32 %v1684_v46, %v1444_v56  ;;  %v457_v48 = vpop.f32.mrb[15].mxu1  ;;  %1710 = vmatmul.mubr.bf16.gmra.mrb[24].mxu0 %v490_v40  ;;  %v483_v50 = vmax.f32 %v463_v43, 0.0 }
 0x1eb   :  { %v458_v49 = vadd.f32 %v1444_v56, %v457_v48  ;;  %v481_v52 = vmax.f32 %v455_v45, 0.0  ;;  %v1909_v56 = vld [vmem:[%s2304_s7 + $0x10] sm:$0xff]  }
 0x1ec   :  { %v484_v51 = vmax.f32 %v466_v47, 0.0  ;;  %1753 = vmatprep.subr.bf16.mxu0 %v1909_v56 }
 0x1ed   :  { %v482_v53 = vmax.f32 %v458_v49, 0.0  ;;  %1754 = vmatpush3.bf16.msra.mxu0 %v1909_v56 }
 0x1ee   :  { %v492_v54 = vpack.c.bf16 %v484_v51, %v483_v50  ;;  %1755 = vmatprep.subr.bf16.mxu0 %v1910_v59 }
 0x1ef   :  { %v491_v55 = vpack.c.bf16 %v482_v53, %v481_v52 }
 0x1f1   :  { %1713 = vmatprep.mubr.bf16.mxu0 %v491_v55  ;;  %1756 = vmatpush3.bf16.msra.mxu0 %v1910_v59 }
 0x1f2   :  { %1714 = vmatmul.mubr.bf16.gmra.mrb[28].mxu0 %v492_v54  ;;  %1757 = vmatprep.subr.bf16.mxu0 %v1911_v60 }
 0x1f5   :  { %1758 = vmatpush3.bf16.msra.mxu0 %v1911_v60 }
 0x1f6   :  { %1759 = vmatprep.subr.bf16.mxu0 %v1912_v61 }
 0x1f9   :  { %1760 = vmatpush3.bf16.msra.mxu0 %v1912_v61 }
 0x1fa   :  { %1761 = vmatprep.subr.bf16.mxu0 %v1913_v62 }
 0x1fd   :  { %1762 = vmatpush3.bf16.msra.mxu0 %v1913_v62 }
 0x2ad   :  { %v1703_v0 = vpop.f32.mrb[16].mxu0 }
 0x2ae   :  { %v590_v1 = vadd.f32 %v1703_v0, %v1453_v63  ;;  %v581_v2 = vpop.f32.mrb[17].mxu0 }
 0x2af   :  { %v582_v3 = vadd.f32 %v1453_v63, %v581_v2  ;;  %v1704_v4 = vpop.f32.mrb[18].mxu0 }
 0x2b0   :  { %v593_v5 = vadd.f32 %v1704_v4, %v1453_v63  ;;  %v584_v6 = vpop.f32.mrb[19].mxu0  ;;  %v646_v8 = vmax.f32 %v590_v1, 0.0 }
 0x2b1   :  { %v585_v7 = vadd.f32 %v1453_v63, %v584_v6  ;;  %v644_v10 = vmax.f32 %v582_v3, 0.0 }
 0x2b2   :  { %v647_v9 = vmax.f32 %v593_v5, 0.0 }
 0x2b3   :  { %v645_v11 = vmax.f32 %v585_v7, 0.0 }
 0x2b4   :  { %v661_v12 = vpack.c.bf16 %v647_v9, %v646_v8 }
 0x2b5   :  { %v660_v13 = vpack.c.bf16 %v645_v11, %v644_v10  ;;  %v1707_v16 = vpop.f32.mrb[20].mxu0 }
 0x2b6   :  { %v606_v17 = vadd.f32 %v1707_v16, %v1453_v63  ;;  %v597_v23 = vpop.f32.mrb[21].mxu0 }
 0x2b7   :  { %v598_v24 = vadd.f32 %v1453_v63, %v597_v23  ;;  %v1708_v25 = vpop.f32.mrb[22].mxu0  ;;  %1717 = vmatprep.subr.bf16.mxu1 %v660_v13 }
 0x2b8   :  { %v609_v26 = vadd.f32 %v1708_v25, %v1453_v63  ;;  %v600_v27 = vpop.f32.mrb[23].mxu0  ;;  %1718 = vmatpush3.bf16.msra.mxu1 %v660_v13  ;;  %v650_v29 = vmax.f32 %v606_v17, 0.0 }
 0x2b9   :  { %v601_v28 = vadd.f32 %v1453_v63, %v600_v27  ;;  %1719 = vmatprep.subr.bf16.mxu1 %v661_v12  ;;  %v648_v31 = vmax.f32 %v598_v24, 0.0 }
 0x2ba   :  { %v651_v30 = vmax.f32 %v609_v26, 0.0 }
 0x2bb   :  { %v649_v32 = vmax.f32 %v601_v28, 0.0 }
 0x2bc   :  { %v663_v33 = vpack.c.bf16 %v651_v30, %v650_v29  ;;  %1720 = vmatpush3.bf16.msra.mxu1 %v661_v12  ;;  %v1921_v30 = vld [vmem:[%s2306_s9 + $0x30] sm:$0xff]  }
 0x2bd   :  { %v662_v34 = vpack.c.bf16 %v649_v32, %v648_v31  ;;  %v1711_v35 = vpop.f32.mrb[24].mxu0  ;;  %v1922_v31 = vld [vmem:[%s2306_s9 + $0x38] sm:$0xff]   ;;  %v1462_v32 = vld [vmem:[%s2307_s8] ss:$0 sm:$0xff] }
 0x2be   :  { %v622_v36 = vadd.f32 %v1711_v35, %v1453_v63  ;;  %v613_v37 = vpop.f32.mrb[25].mxu0 }
 0x2bf   :  { %v614_v38 = vadd.f32 %v1453_v63, %v613_v37  ;;  %v1712_v39 = vpop.f32.mrb[26].mxu0  ;;  %1721 = vmatprep.subr.bf16.mxu1 %v662_v34 }
 0x2c0   :  { %v625_v40 = vadd.f32 %v1712_v39, %v1453_v63  ;;  %v616_v41 = vpop.f32.mrb[27].mxu0  ;;  %1722 = vmatpush3.bf16.msra.mxu1 %v662_v34  ;;  %v654_v43 = vmax.f32 %v622_v36, 0.0 }
 0x2c1   :  { %v617_v42 = vadd.f32 %v1453_v63, %v616_v41  ;;  %1723 = vmatprep.subr.bf16.mxu1 %v663_v33  ;;  %v652_v45 = vmax.f32 %v614_v38, 0.0 }
 0x2c2   :  { %v655_v44 = vmax.f32 %v625_v40, 0.0 }
 0x2c3   :  { %v653_v46 = vmax.f32 %v617_v42, 0.0 }
 0x2c4   :  { %v665_v47 = vpack.c.bf16 %v655_v44, %v654_v43  ;;  %1724 = vmatpush3.bf16.msra.mxu1 %v663_v33 }
 0x2c5   :  { %v664_v48 = vpack.c.bf16 %v653_v46, %v652_v45  ;;  %v1715_v49 = vpop.f32.mrb[28].mxu0 }
 0x2c6   :  { %v638_v50 = vadd.f32 %v1715_v49, %v1453_v63  ;;  %v629_v51 = vpop.f32.mrb[29].mxu0 }
 0x2c7   :  { %v630_v52 = vadd.f32 %v1453_v63, %v629_v51  ;;  %v1716_v53 = vpop.f32.mrb[30].mxu0  ;;  %1725 = vmatprep.subr.bf16.mxu1 %v664_v48 }
 0x2c8   :  { %v641_v54 = vadd.f32 %v1716_v53, %v1453_v63  ;;  %v632_v55 = vpop.f32.mrb[31].mxu0  ;;  %1726 = vmatpush3.bf16.msra.mxu1 %v664_v48  ;;  %v658_v58 = vmax.f32 %v638_v50, 0.0 }
 0x2c9   :  { %v633_v57 = vadd.f32 %v1453_v63, %v632_v55  ;;  %1727 = vmatprep.subr.bf16.mxu1 %v665_v47  ;;  %v656_v59 = vmax.f32 %v630_v52, 0.0  ;;  %v1914_v63 = vld [vmem:[%s2304_s7 + $0x38] sm:$0xff]  }
 0x2ca   :  { %v659_v56 = vmax.f32 %v641_v54, 0.0  ;;  %1763 = vmatprep.subr.bf16.mxu0 %v1914_v63 }
 0x2cb   :  { %v657_v60 = vmax.f32 %v633_v57, 0.0  ;;  %1764 = vmatpush3.bf16.msra.mxu0 %v1914_v63 }
 0x2cc   :  { %v667_v61 = vpack.c.bf16 %v659_v56, %v658_v58  ;;  %1728 = vmatpush3.bf16.msra.mxu1 %v665_v47 }
 0x2cd   :  { %v666_v62 = vpack.c.bf16 %v657_v60, %v656_v59 }
 0x2cf   :  { %1729 = vmatprep.subr.bf16.mxu1 %v666_v62 }
 0x2d0   :  { %1730 = vmatpush3.bf16.msra.mxu1 %v666_v62 }
 0x2d1   :  { %1731 = vmatprep.subr.bf16.mxu1 %v667_v61 }
 0x2d4   :  { %1732 = vmatpush3.bf16.msra.mxu1 %v667_v61 }
 0x2d7   :  { %1734 = vmatmul.mubr.bf16.vlgmr.msra.gmra.mrb[16].mxu1 %v2069_v14  ;;  %v1915_v14 = vld [vmem:[%s2306_s9] sm:$0xff]  }
 0x2d8   :  { %1737 = vmatprep.mubr.bf16.mxu1 %v2074_v15  ;;  %v1916_v15 = vld [vmem:[%s2306_s9 + $0x8] sm:$0xff]   ;;  %1781 = vmatprep.subr.bf16.mxu1 %v1915_v14 }
 0x2d9   :  { %1782 = vmatpush3.bf16.msra.mxu1 %v1915_v14 }
 0x2da   :  { %1783 = vmatprep.subr.bf16.mxu1 %v1916_v15 }
 0x2dd   :  { %1784 = vmatpush3.bf16.msra.mxu1 %v1916_v15 }
 0x2df   :  { %1738 = vmatmul.mubr.bf16.gmra.mrb[20].mxu1 %v2087_v18  ;;  %v1917_v18 = vld [vmem:[%s2306_s9 + $0x10] sm:$0xff]  }
 0x2e0   :  { %1741 = vmatprep.mubr.bf16.mxu1 %v2092_v19  ;;  %1785 = vmatprep.subr.bf16.mxu1 %v1917_v18  ;;  %v1918_v19 = vld [vmem:[%s2306_s9 + $0x18] sm:$0xff]  }
 0x2e1   :  { %1786 = vmatpush3.bf16.msra.mxu1 %v1917_v18 }
 0x2e2   :  { %1787 = vmatprep.subr.bf16.mxu1 %v1918_v19 }
 0x2e5   :  { %1788 = vmatpush3.bf16.msra.mxu1 %v1918_v19 }
 0x2e7   :  { %1742 = vmatmul.mubr.bf16.gmra.mrb[24].mxu1 %v2099_v20  ;;  %v1919_v20 = vld [vmem:[%s2306_s9 + $0x20] sm:$0xff]  }
 0x2e8   :  { %1745 = vmatprep.mubr.bf16.mxu1 %v2104_v21  ;;  %1789 = vmatprep.subr.bf16.mxu1 %v1919_v20  ;;  %v1920_v21 = vld [vmem:[%s2306_s9 + $0x28] sm:$0xff]  }
 0x2e9   :  { %1790 = vmatpush3.bf16.msra.mxu1 %v1919_v20 }
 0x2ea   :  { %1791 = vmatprep.subr.bf16.mxu1 %v1920_v21 }
 0x2ed   :  { %1792 = vmatpush3.bf16.msra.mxu1 %v1920_v21 }
 0x2ee   :  { %1793 = vmatprep.subr.bf16.mxu1 %v1921_v30 }
 0x2ef   :  { %1746 = vmatmul.mubr.bf16.gmra.mrb[28].mxu1 %v2111_v22 }
 0x2f1   :  { %1794 = vmatpush3.bf16.msra.mxu1 %v1921_v30  ;;  %v1927_v30 = vld [vmem:[%s2308_s11 + $0x20] sm:$0xff]  }
 0x2f2   :  { %1795 = vmatprep.subr.bf16.mxu1 %v1922_v31 }
 0x2f5   :  { %1796 = vmatpush3.bf16.msra.mxu1 %v1922_v31  ;;  %v1928_v31 = vld [vmem:[%s2308_s11 + $0x28] sm:$0xff]  }
 0x3aa   :  { %v1735_v22 = vpop.f32.mrb[16].mxu1 }
 0x3ab   :  { %v736_v0 = vpop.f32.mrb[17].mxu1 }
 0x3ac   :  { %v1736_v1 = vpop.f32.mrb[18].mxu1 }
 0x3ad   :  { %v800_v2 = vpack.c.bf16 %v1736_v1, %v1735_v22  ;;  %v739_v3 = vpop.f32.mrb[19].mxu1 }
 0x3ae   :  { %v799_v4 = vpack.c.bf16 %v739_v3, %v736_v0 }
 0x3b0   :  { %1765 = vmatprep.mubr.bf16.mxu0 %v799_v4 }
 0x3b1   :  { %1766 = vmatmul.mubr.bf16.vlgmr.msra.gmra.mrb[32].mxu0 %v800_v2 }
 0x3b2   :  { %v1739_v5 = vpop.f32.mrb[20].mxu1 }
 0x3b3   :  { %v752_v6 = vpop.f32.mrb[21].mxu1 }
 0x3b4   :  { %v1740_v7 = vpop.f32.mrb[22].mxu1 }
 0x3b5   :  { %v802_v8 = vpack.c.bf16 %v1740_v7, %v1739_v5  ;;  %v755_v9 = vpop.f32.mrb[23].mxu1 }
 0x3b6   :  { %v801_v10 = vpack.c.bf16 %v755_v9, %v752_v6 }
 0x3b8   :  { %1769 = vmatprep.mubr.bf16.mxu0 %v801_v10 }
 0x3b9   :  { %1770 = vmatmul.mubr.bf16.gmra.mrb[36].mxu0 %v802_v8 }
 0x3ba   :  { %v1743_v11 = vpop.f32.mrb[24].mxu1 }
 0x3bb   :  { %v768_v12 = vpop.f32.mrb[25].mxu1 }
 0x3bc   :  { %v1744_v13 = vpop.f32.mrb[26].mxu1 }
 0x3bd   :  { %v804_v16 = vpack.c.bf16 %v1744_v13, %v1743_v11  ;;  %v771_v17 = vpop.f32.mrb[27].mxu1 }
 0x3be   :  { %v803_v23 = vpack.c.bf16 %v771_v17, %v768_v12 }
 0x3c0   :  { %1773 = vmatprep.mubr.bf16.mxu0 %v803_v23 }
 0x3c1   :  { %1774 = vmatmul.mubr.bf16.gmra.mrb[40].mxu0 %v804_v16 }
 0x3c2   :  { %v1747_v24 = vpop.f32.mrb[28].mxu1 }
 0x3c3   :  { %v784_v25 = vpop.f32.mrb[29].mxu1 }
 0x3c4   :  { %v1748_v26 = vpop.f32.mrb[30].mxu1 }
 0x3c5   :  { %v806_v27 = vpack.c.bf16 %v1748_v26, %v1747_v24  ;;  %v787_v28 = vpop.f32.mrb[31].mxu1  ;;  %v1923_v26 = vld [vmem:[%s2308_s11] sm:$0xff]  }
 0x3c6   :  { %v805_v29 = vpack.c.bf16 %v787_v28, %v784_v25  ;;  %v1939_v25 = vmov 0.0   ;;  %v1925_v28 = vld [vmem:[%s2308_s11 + $0x10] sm:$0xff]  }
 0x3c7   :  { %1813 = vmatprep.subr.bf16.mxu0 %v1939_v25  ;;  %1833 = vmatprep.subr.bf16.mxu1 %v1939_v25 }
 0x3c8   :  { %1777 = vmatprep.mubr.bf16.mxu0 %v805_v29  ;;  %v1926_v29 = vld [vmem:[%s2308_s11 + $0x18] sm:$0xff]  }
 0x3c9   :  { %1778 = vmatmul.mubr.bf16.gmra.mrb[44].mxu0 %v806_v27  ;;  %v1924_v27 = vld [vmem:[%s2308_s11 + $0x8] sm:$0xff]  }
 0x3ca   :  { %1829 = vmatprep.mubr.msk.bf16.mxu0 %vm1940_vm0, %v1939_v25 }
 0x484   :  { %v1767_v33 = vpop.f32.mrb[32].mxu0 }
 0x485   :  { %v904_v34 = vadd.f32 %v1767_v33, %v1462_v32  ;;  %v895_v35 = vpop.f32.mrb[33].mxu0  ;;  %v1471_v33 = vld [vmem:[%s2309_s10] ss:$0 sm:$0xff] }
 0x486   :  { %v896_v36 = vadd.f32 %v1462_v32, %v895_v35  ;;  %v1768_v37 = vpop.f32.mrb[34].mxu0 }
 0x487   :  { %v907_v38 = vadd.f32 %v1768_v37, %v1462_v32  ;;  %v898_v39 = vpop.f32.mrb[35].mxu0  ;;  %v960_v41 = vmax.f32 %v904_v34, 0.0 }
 0x488   :  { %v899_v40 = vadd.f32 %v1462_v32, %v898_v39  ;;  %v958_v43 = vmax.f32 %v896_v36, 0.0 }
 0x489   :  { %v961_v42 = vmax.f32 %v907_v38, 0.0 }
 0x48a   :  { %v959_v44 = vmax.f32 %v899_v40, 0.0 }
 0x48b   :  { %v975_v45 = vpack.c.bf16 %v961_v42, %v960_v41 }
 0x48c   :  { %v974_v46 = vpack.c.bf16 %v959_v44, %v958_v43  ;;  %v1771_v47 = vpop.f32.mrb[36].mxu0 }
 0x48d   :  { %v920_v48 = vadd.f32 %v1771_v47, %v1462_v32  ;;  %v911_v49 = vpop.f32.mrb[37].mxu0 }
 0x48e   :  { %v912_v50 = vadd.f32 %v1462_v32, %v911_v49  ;;  %v1772_v51 = vpop.f32.mrb[38].mxu0  ;;  %1797 = vmatprep.mubr.bf16.mxu1 %v974_v46 }
 0x48f   :  { %v923_v52 = vadd.f32 %v1772_v51, %v1462_v32  ;;  %v914_v53 = vpop.f32.mrb[39].mxu0  ;;  %1798 = vmatmul.mubr.bf16.vlgmr.msra.gmra.mrb[32].mxu1 %v975_v45  ;;  %v964_v55 = vmax.f32 %v920_v48, 0.0 }
 0x490   :  { %v915_v54 = vadd.f32 %v1462_v32, %v914_v53  ;;  %v962_v58 = vmax.f32 %v912_v50, 0.0  ;;  %1834 = vmatpush3.bf16.msra.mxu1 %v1923_v26 }
 0x491   :  { %v965_v57 = vmax.f32 %v923_v52, 0.0  ;;  %1835 = vmatprep.subr.bf16.mxu1 %v1939_v25 }
 0x492   :  { %v963_v56 = vmax.f32 %v915_v54, 0.0 }
 0x493   :  { %v977_v59 = vpack.c.bf16 %v965_v57, %v964_v55 }
 0x494   :  { %v976_v60 = vpack.c.bf16 %v963_v56, %v962_v58  ;;  %v1775_v61 = vpop.f32.mrb[40].mxu0  ;;  %1836 = vmatpush3.bf16.msra.mxu1 %v1924_v27  ;;  %v1191_v27 = vld [vmem:[%s2310_s1] sm:$0xf] }
 0x495   :  { %v936_v62 = vadd.f32 %v1775_v61, %v1462_v32  ;;  %v927_v63 = vpop.f32.mrb[41].mxu0  ;;  %1837 = vmatprep.subr.bf16.mxu1 %v1939_v25 }
 0x496   :  { %v928_v14 = vadd.f32 %v1462_v32, %v927_v63  ;;  %v1776_v15 = vpop.f32.mrb[42].mxu0  ;;  %1801 = vmatprep.mubr.bf16.mxu1 %v976_v60 }
 0x497   :  { %v939_v18 = vadd.f32 %v1776_v15, %v1462_v32  ;;  %v930_v19 = vpop.f32.mrb[43].mxu0  ;;  %1802 = vmatmul.mubr.bf16.gmra.mrb[36].mxu1 %v977_v59  ;;  %v968_v21 = vmax.f32 %v936_v62, 0.0 }
 0x498   :  { %v931_v20 = vadd.f32 %v1462_v32, %v930_v19  ;;  %v966_v0 = vmax.f32 %v928_v14, 0.0  ;;  %1838 = vmatpush3.bf16.msra.mxu1 %v1925_v28  ;;  %v1930_v28 = vld [vmem:[%s2308_s11 + $0x38] sm:$0xff]  }
 0x499   :  { %v969_v22 = vmax.f32 %v939_v18, 0.0  ;;  %1839 = vmatprep.subr.bf16.mxu1 %v1939_v25 }
 0x49a   :  { %v967_v1 = vmax.f32 %v931_v20, 0.0 }
 0x49b   :  { %v979_v2 = vpack.c.bf16 %v969_v22, %v968_v21 }
 0x49c   :  { %v978_v3 = vpack.c.bf16 %v967_v1, %v966_v0  ;;  %v1779_v4 = vpop.f32.mrb[44].mxu0  ;;  %1840 = vmatpush3.bf16.msra.mxu1 %v1926_v29  ;;  %v1931_v29 = vld [vmem:[%s2311_s13] sm:$0xff]  }
 0x49d   :  { %v952_v5 = vadd.f32 %v1779_v4, %v1462_v32  ;;  %v943_v6 = vpop.f32.mrb[45].mxu0  ;;  %1841 = vmatprep.subr.bf16.mxu1 %v1939_v25 }
 0x49e   :  { %v944_v7 = vadd.f32 %v1462_v32, %v943_v6  ;;  %v1780_v8 = vpop.f32.mrb[46].mxu0  ;;  %1805 = vmatprep.mubr.bf16.mxu1 %v978_v3 }
 0x49f   :  { %v955_v9 = vadd.f32 %v1780_v8, %v1462_v32  ;;  %v946_v10 = vpop.f32.mrb[47].mxu0  ;;  %1806 = vmatmul.mubr.bf16.gmra.mrb[40].mxu1 %v979_v2  ;;  %v972_v12 = vmax.f32 %v952_v5, 0.0 }
 0x4a0   :  { %v947_v11 = vadd.f32 %v1462_v32, %v946_v10  ;;  %v970_v16 = vmax.f32 %v944_v7, 0.0  ;;  %1842 = vmatpush3.bf16.msra.mxu1 %v1927_v30  ;;  %v1929_v32 = vld [vmem:[%s2308_s11 + $0x30] sm:$0xff]   ;;  %v1932_v30 = vld [vmem:[%s2311_s13 + $0x8] sm:$0xff]  }
 0x4a1   :  { %v973_v13 = vmax.f32 %v955_v9, 0.0  ;;  %1843 = vmatprep.subr.bf16.mxu1 %v1939_v25 }
 0x4a2   :  { %v971_v17 = vmax.f32 %v947_v11, 0.0 }
 0x4a3   :  { %v981_v23 = vpack.c.bf16 %v973_v13, %v972_v12 }
 0x4a4   :  { %v980_v24 = vpack.c.bf16 %v971_v17, %v970_v16  ;;  %1844 = vmatpush3.bf16.msra.mxu1 %v1928_v31  ;;  %v1933_v31 = vld [vmem:[%s2311_s13 + $0x10] sm:$0xff]  }
 0x4a5   :  { %1845 = vmatprep.subr.bf16.mxu1 %v1939_v25 }
 0x4a6   :  { %1809 = vmatprep.mubr.bf16.mxu1 %v980_v24 }
 0x4a7   :  { %1810 = vmatmul.mubr.bf16.gmra.mrb[44].mxu1 %v981_v23 }
 0x4a8   :  { %1849 = vmatprep.mubr.msk.bf16.mxu1 %vm1940_vm0, %v1939_v25  ;;  %1846 = vmatpush3.bf16.msra.mxu1 %v1929_v32  ;;  %v1934_v32 = vld [vmem:[%s2311_s13 + $0x18] sm:$0xff]  }
 0x4a9   :  { %1847 = vmatprep.subr.bf16.mxu1 %v1939_v25 }
 0x4ac   :  { %1848 = vmatpush3.bf16.msra.mxu1 %v1930_v28 }
 0x562   :  { %v1799_v34 = vpop.f32.mrb[32].mxu1 }
 0x563   :  { %v1079_v35 = vadd.f32 %v1799_v34, %v1471_v33  ;;  %v1070_v36 = vpop.f32.mrb[33].mxu1  ;;  %v1936_v34 = vld [vmem:[%s2311_s13 + $0x28] sm:$0xff]  }
 0x564   :  { %v1071_v37 = vadd.f32 %v1471_v33, %v1070_v36  ;;  %v1800_v38 = vpop.f32.mrb[34].mxu1 }
 0x565   :  { %v1082_v39 = vadd.f32 %v1800_v38, %v1471_v33  ;;  %v1073_v40 = vpop.f32.mrb[35].mxu1  ;;  %v1135_v42 = vmax.f32 %v1079_v35, 0.0 }
 0x566   :  { %v1074_v41 = vadd.f32 %v1471_v33, %v1073_v40  ;;  %v1133_v44 = vmax.f32 %v1071_v37, 0.0  ;;  %v1937_v40 = vld [vmem:[%s2311_s13 + $0x30] sm:$0xff]  }
 0x567   :  { %v1136_v43 = vmax.f32 %v1082_v39, 0.0 }
 0x568   :  { %v1134_v45 = vmax.f32 %v1074_v41, 0.0  ;;  %v1938_v41 = vld [vmem:[%s2311_s13 + $0x38] sm:$0xff]  }
 0x569   :  { %v1150_v46 = vpack.c.bf16 %v1136_v43, %v1135_v42  ;;  %v1480_v42 = vld [vmem:[%s2312_s12] ss:$0 sm:$0xff] }
 0x56a   :  { %v1149_v47 = vpack.c.bf16 %v1134_v45, %v1133_v44  ;;  %v1803_v48 = vpop.f32.mrb[36].mxu1 }
 0x56b   :  { %v1095_v49 = vadd.f32 %v1803_v48, %v1471_v33  ;;  %v1086_v50 = vpop.f32.mrb[37].mxu1 }
 0x56c   :  { %v1087_v51 = vadd.f32 %v1471_v33, %v1086_v50  ;;  %v1804_v52 = vpop.f32.mrb[38].mxu1  ;;  %1814 = vmatpush3.bf16.msra.mxu0 %v1149_v47 }
 0x56d   :  { %v1098_v53 = vadd.f32 %v1804_v52, %v1471_v33  ;;  %v1089_v54 = vpop.f32.mrb[39].mxu1  ;;  %1815 = vmatprep.subr.bf16.mxu0 %v1939_v25  ;;  %v1139_v57 = vmax.f32 %v1095_v49, 0.0 }
 0x56e   :  { %v1090_v55 = vadd.f32 %v1471_v33, %v1089_v54  ;;  %v1137_v56 = vmax.f32 %v1087_v51, 0.0 }
 0x56f   :  { %v1140_v58 = vmax.f32 %v1098_v53, 0.0 }
 0x570   :  { %v1138_v59 = vmax.f32 %v1090_v55, 0.0  ;;  %1816 = vmatpush3.bf16.msra.mxu0 %v1150_v46 }
 0x571   :  { %v1152_v60 = vpack.c.bf16 %v1140_v58, %v1139_v57  ;;  %1817 = vmatprep.subr.bf16.mxu0 %v1939_v25 }
 0x572   :  { %v1151_v61 = vpack.c.bf16 %v1138_v59, %v1137_v56  ;;  %v1807_v62 = vpop.f32.mrb[40].mxu1 }
 0x573   :  { %v1111_v63 = vadd.f32 %v1807_v62, %v1471_v33  ;;  %v1102_v14 = vpop.f32.mrb[41].mxu1 }
 0x574   :  { %v1103_v15 = vadd.f32 %v1471_v33, %v1102_v14  ;;  %v1808_v18 = vpop.f32.mrb[42].mxu1  ;;  %1818 = vmatpush3.bf16.msra.mxu0 %v1151_v61 }
 0x575   :  { %v1114_v19 = vadd.f32 %v1808_v18, %v1471_v33  ;;  %v1105_v20 = vpop.f32.mrb[43].mxu1  ;;  %1819 = vmatprep.subr.bf16.mxu0 %v1939_v25  ;;  %v1143_v22 = vmax.f32 %v1111_v63, 0.0 }
 0x576   :  { %v1106_v21 = vadd.f32 %v1471_v33, %v1105_v20  ;;  %v1141_v1 = vmax.f32 %v1103_v15, 0.0 }
 0x577   :  { %v1144_v0 = vmax.f32 %v1114_v19, 0.0 }
 0x578   :  { %v1142_v2 = vmax.f32 %v1106_v21, 0.0  ;;  %1820 = vmatpush3.bf16.msra.mxu0 %v1152_v60 }
 0x579   :  { %v1154_v3 = vpack.c.bf16 %v1144_v0, %v1143_v22  ;;  %1821 = vmatprep.subr.bf16.mxu0 %v1939_v25 }
 0x57a   :  { %v1153_v4 = vpack.c.bf16 %v1142_v2, %v1141_v1  ;;  %v1811_v5 = vpop.f32.mrb[44].mxu1 }
 0x57b   :  { %v1127_v6 = vadd.f32 %v1811_v5, %v1471_v33  ;;  %v1118_v7 = vpop.f32.mrb[45].mxu1 }
 0x57c   :  { %v1119_v8 = vadd.f32 %v1471_v33, %v1118_v7  ;;  %v1812_v9 = vpop.f32.mrb[46].mxu1  ;;  %1822 = vmatpush3.bf16.msra.mxu0 %v1153_v4 }
 0x57d   :  { %v1130_v10 = vadd.f32 %v1812_v9, %v1471_v33  ;;  %v1121_v11 = vpop.f32.mrb[47].mxu1  ;;  %1823 = vmatprep.subr.bf16.mxu0 %v1939_v25  ;;  %v1147_v13 = vmax.f32 %v1127_v6, 0.0 }
 0x57e   :  { %v1122_v12 = vadd.f32 %v1471_v33, %v1121_v11  ;;  %v1145_v17 = vmax.f32 %v1119_v8, 0.0  ;;  %v1935_v33 = vld [vmem:[%s2311_s13 + $0x20] sm:$0xff]  }
 0x57f   :  { %v1148_v16 = vmax.f32 %v1130_v10, 0.0 }
 0x580   :  { %v1146_v23 = vmax.f32 %v1122_v12, 0.0  ;;  %1824 = vmatpush3.bf16.msra.mxu0 %v1154_v3 }
 0x581   :  { %v1156_v24 = vpack.c.bf16 %v1148_v16, %v1147_v13  ;;  %1825 = vmatprep.subr.bf16.mxu0 %v1939_v25 }
 0x582   :  { %v1155_v26 = vpack.c.bf16 %v1146_v23, %v1145_v17 }
 0x584   :  { %1826 = vmatpush3.bf16.msra.mxu0 %v1155_v26 }
 0x585   :  { %1827 = vmatprep.subr.bf16.mxu0 %v1939_v25 }
 0x588   :  { %1828 = vmatpush3.bf16.msra.mxu0 %v1156_v24 }
 0x589   :  { %1853 = vmatprep.subr.bf16.mxu0 %v1939_v25 }
 0x58b   :  { %1830 = vmatmul.mubr.bf16.vlgmr.msra.gmra.mrb[48].mxu0 %v1191_v27 }
 0x58c   :  { %1869 = vmatprep.mubr.msk.bf16.mxu0 %vm1940_vm0, %v1939_v25  ;;  %1854 = vmatpush3.bf16.msra.mxu0 %v1931_v29 }
 0x58d   :  { %1855 = vmatprep.subr.bf16.mxu0 %v1939_v25 }
 0x590   :  { %1856 = vmatpush3.bf16.msra.mxu0 %v1932_v30 }
 0x591   :  { %1857 = vmatprep.subr.bf16.mxu0 %v1939_v25 }
 0x594   :  { %1858 = vmatpush3.bf16.msra.mxu0 %v1933_v31 }
 0x595   :  { %1859 = vmatprep.subr.bf16.mxu0 %v1939_v25 }
 0x598   :  { %1860 = vmatpush3.bf16.msra.mxu0 %v1934_v32 }
 0x599   :  { %1861 = vmatprep.subr.bf16.mxu0 %v1939_v25 }
 0x59c   :  { %1862 = vmatpush3.bf16.msra.mxu0 %v1935_v33 }
 0x59d   :  { %1863 = vmatprep.subr.bf16.mxu0 %v1939_v25 }
 0x5a0   :  { %1864 = vmatpush3.bf16.msra.mxu0 %v1936_v34 }
 0x5a1   :  { %1865 = vmatprep.subr.bf16.mxu0 %v1939_v25 }
 0x5a4   :  { %1866 = vmatpush3.bf16.msra.mxu0 %v1937_v40 }
 0x5a5   :  { %1867 = vmatprep.subr.bf16.mxu0 %v1939_v25  ;;  %v1489_v25 = vld [vmem:[%s2313_s14] ss:$0 sm:$0xff] }
 0x5a8   :  { %1868 = vmatpush3.bf16.msra.mxu0 %v1938_v41 }
 0x65e   :  { %v1226_v35 = vpop.f32.mrb[48].mxu0 }
 0x65f   :  { %v1232_v36 = vpack.c.bf16 %v1226_v35, %v1226_v35  ;;  %v1831_v37 = vpop.f32.mrb[49].mxu0 }
 0x660   :  { %v1229_v38 = vpop.f32.mrb[50].mxu0 }
 0x661   :  { %v1832_v39 = vpop.f32.mrb[51].mxu0  ;;  %1850 = vmatmul.mubr.bf16.vlgmr.msra.gmra.mrb[48].mxu1 %v1232_v36 }
 0x734   :  { %v1321_v43 = vpop.f32.mrb[48].mxu1 }
 0x735   :  { %v1322_v44 = vadd.f32 %v1480_v42, %v1321_v43  ;;  %v1851_v45 = vpop.f32.mrb[49].mxu1 }
 0x736   :  { %v1324_v46 = vpop.f32.mrb[50].mxu1 }
 0x737   :  { %v1327_v47 = vmax.f32 %v1322_v44, 0.0  ;;  %v1852_v48 = vpop.f32.mrb[51].mxu1 }
 0x739   :  { %v1328_v49 = vpack.c.bf16 %v1327_v47, %v1327_v47 }
 0x73b   :  { %1870 = vmatmul.mubr.bf16.vlgmr.msra.gmra.mrb[52].mxu0 %v1328_v49 }
 0x80e   :  { %v1417_v50 = vpop.f32.mrb[52].mxu0 }
 0x80f   :  { %v1418_v51 = vadd.f32 %v1489_v25, %v1417_v50  ;;  %v1871_v52 = vpop.f32.mrb[53].mxu0 }
 0x810   :  { %v1420_v53 = vpop.f32.mrb[54].mxu0 }
 0x811   :  { %1423 = vst [vmem:[%s2314_s15] sm:$0xff] %v1418_v51  ;;  %v1872_v54 = vpop.f32.mrb[55].mxu0 }

</bundles_post_ra>
